<compile_context>
chip_gen: v7x
topology: tpu7x:2x2x1
jax: 0.10.0
libtpu: 0.0.40
codegen_flags: <defaults>
</compile_context>

<pallas_src>
import functools

import jax
import jax.numpy as jnp
from jax.experimental import pallas as pl
from jax.experimental.pallas import tpu as pltpu

LANE = 128  # padded output lane width (vreg lane count)


def meta_classifier_kernel(x_ref, w1_ref, b1_ref, w2_ref, b2_ref, out_ref):
    # x_ref : (TILE_B, n_in)    fc input tile
    # w1_ref: (n_in, hidden)    fc weight (pre-transposed, resident)
    # b1_ref: (1, hidden)       fc bias
    # w2_ref: (hidden, LANE)    fc2 weight, zero-padded to 128 output lanes
    # b2_ref: (1, LANE)         fc2 bias, padded lanes = -1e9 (large finite neg)
    # out_ref: (TILE_B, LANE)   softmax probs (padded lanes ~ 0), lane-dense
    x = x_ref[...]

    # fc + ReLU  (MXU matmul, f32 accumulation)
    h = jnp.dot(x, w1_ref[...], preferred_element_type=jnp.float32) + b1_ref[...]
    h = jnp.maximum(h, 0.0)

    # fc2 (padded to 128 output lanes -> unmasked, lane-dense stores downstream)
    logits = jnp.dot(h, w2_ref[...], preferred_element_type=jnp.float32) + b2_ref[...]

    # Numerically-stable softmax over the class dim (dim=1, matching nn.Softmax()).
    # Padded lanes carry ~-1e9 logits -> exp ~ 0 -> they don't affect the denom.
    m = jnp.max(logits, axis=-1, keepdims=True)
    e = jnp.exp(logits - m)
    denom = jnp.sum(e, axis=-1, keepdims=True)
    # exact reciprocal: keeps row sums within 1e-5 of 1.0
    out_ref[...] = e * pl.reciprocal(denom, approx=False)


def prepare_params(w_fc, b_fc, w_fc2, b_fc2):
    """One-time conversion from PyTorch Linear layout (out,in) to kernel layout.

    fc2 is padded to 128 output lanes (zero weight columns, -1e9 bias) so the
    kernel's output block is lane-dense.  Hoisted out of the per-call path so
    no transpose/pad XLA ops are emitted per forward call.
    """
    hidden, n_in = w_fc.shape
    n_out = w_fc2.shape[0]
    assert w_fc2.shape == (n_out, hidden)
    assert n_out <= LANE

    w1 = jnp.asarray(w_fc.T, jnp.float32)                      # (n_in, hidden)
    b1 = jnp.asarray(b_fc, jnp.float32).reshape(1, hidden)     # (1, hidden)

    w2 = jnp.zeros((hidden, LANE), jnp.float32)
    w2 = w2.at[:, :n_out].set(jnp.asarray(w_fc2.T, jnp.float32))   # (hidden, 128)
    # large finite negative (NOT -inf) so max/exp never produce inf-inf NaNs
    b2 = jnp.full((1, LANE), -1e9, jnp.float32)
    b2 = b2.at[0, :n_out].set(jnp.asarray(b_fc2, jnp.float32))     # (1, 128)
    return w1, b1, w2, b2, n_out


def _choose_tile_b(B, tile_b):
    """Batch tile: multiple of 8 (sublane rule), >= 2 grid steps whenever B > 8
    (so both v7x TensorCores get work), capped at tile_b so padded
    double-buffered blocks stay within the VMEM budget."""
    tile_b = max(8, (int(tile_b) // 8) * 8)   # guard non-multiple-of-8 tile_b
    if B <= 8:
        return B                              # full-array block satisfies the rule
    half = -(-B // 2)                         # cdiv(B, 2)
    half = ((half + 7) // 8) * 8              # round up to sublane multiple
    return min(tile_b, half)


@functools.partial(jax.jit, static_argnames=("n_out", "tile_b"))
def sentiment_meta_classifier(x, w1, b1, w2, b2, *, n_out, tile_b=8192):
    """x: (B, n_classes*2) f32. Returns (B, n_out) f32 softmax probabilities.

    Weights must already be in kernel layout (see prepare_params).
    """
    B, n_in = x.shape
    hidden = w1.shape[1]
    assert w1.shape == (n_in, hidden)
    assert w2.shape == (hidden, LANE)
    assert b2.shape == (1, LANE)

    tb = _choose_tile_b(B, tile_b)
    grid = (pl.cdiv(B, tb),)

    # Advisory cost hint for the XLA scheduler.
    flops = 2 * B * (n_in * hidden + hidden * LANE)
    bytes_accessed = 4 * (
        B * (n_in + LANE) + n_in * hidden + hidden + hidden * LANE + LANE
    )
    cost = pl.CostEstimate(
        flops=flops, transcendentals=B * LANE, bytes_accessed=bytes_accessed
    )

    out_padded = pl.pallas_call(
        meta_classifier_kernel,
        out_shape=jax.ShapeDtypeStruct((B, LANE), jnp.float32),
        grid=grid,
        in_specs=[
            # x: tiled over batch; prefetch of tile i+1 overlaps compute of i.
            pl.BlockSpec((tb, n_in), lambda i: (i, 0)),
            # weights / biases: constant block -> stay resident in VMEM.
            pl.BlockSpec((n_in, hidden), lambda i: (0, 0)),
            pl.BlockSpec((1, hidden), lambda i: (0, 0)),
            pl.BlockSpec((hidden, LANE), lambda i: (0, 0)),
            pl.BlockSpec((1, LANE), lambda i: (0, 0)),
        ],
        # lane-dense output block -> unmasked vst writeback
        out_specs=pl.BlockSpec((tb, LANE), lambda i: (i, 0)),
        compiler_params=pltpu.CompilerParams(
            # independent batch tiles -> shard grid steps across TCs (v7x megacore)
            dimension_semantics=("parallel",),
            # fits padded, double-buffered x/out blocks at tb=8192 (~16 MiB) on
            # every generation: above v5e's 16 MiB scoped default, under v6e's
            # 128 MiB and v7x's 64 MiB physical VMEM.
            vmem_limit_bytes=32 * 1024 * 1024,
        ),
        cost_estimate=cost,
    )(x, w1, b1, w2, b2)

    # Drop the padded lanes (cheap XLA slice in the wrapper).
    return out_padded[:, :n_out]


def reference_forward(x, w_fc, b_fc, w_fc2, b_fc2):
    """Pure-JAX reference matching the PyTorch forward."""
    h = jnp.maximum(x @ w_fc.T + b_fc, 0.0)
    logits = h @ w_fc2.T + b_fc2
    return jax.nn.softmax(logits, axis=1)


if __name__ == "__main__":
    n_classes = 4          # fc input dim = n_classes * 2 = 8
    hidden = 64            # fc output dim / fc2 input dim (see TODO above)
    n_out = 3              # fc2 output dim
    batch = 50             # small; not a multiple of 8 -> exercises partial tiles
                           # (tb = round_up(cdiv(50,2),8) = 32 -> 2 grid steps)

    key = jax.random.PRNGKey(0)
    kx, k1, k2, k3 = jax.random.split(key, 4)

    # Deterministic synthetic parameters (Xavier-ish scale); fc bias = 0.01
    # mirroring reset_linear_weight().
    n_in = n_classes * 2
    w_fc = jax.random.uniform(k1, (hidden, n_in), jnp.float32,
                              minval=-1.0, maxval=1.0) * (6.0 / (n_in + hidden)) ** 0.5
    b_fc = jnp.full((hidden,), 0.01, jnp.float32)
    w_fc2 = jax.random.uniform(k2, (n_out, hidden), jnp.float32,
                               minval=-1.0, maxval=1.0) * (6.0 / (hidden + n_out)) ** 0.5
    b_fc2 = jax.random.normal(k3, (n_out,), jnp.float32) * 0.02

    x = jax.random.normal(kx, (batch, n_in), jnp.float32)

    # One-time parameter layout conversion / lane padding (hoisted out of the call).
    w1, b1, w2, b2, n_out_k = prepare_params(w_fc, b_fc, w_fc2, b_fc2)
    w1, b1, w2, b2 = jax.block_until_ready((w1, b1, w2, b2))

    out = sentiment_meta_classifier(x, w1, b1, w2, b2, n_out=n_out_k)
    out = jax.block_until_ready(out)

    ref = reference_forward(x, w_fc, b_fc, w_fc2, b_fc2)
    assert out.shape == (batch, n_out)
    assert jnp.allclose(out, ref, atol=1e-5, rtol=1e-5), "mismatch vs reference"
    assert jnp.allclose(jnp.sum(out, axis=-1), 1.0, atol=1e-5), "softmax rows must sum to 1"

    print("KERNEL_OK")
</pallas_src>

<mosaic_0001>
module attributes {stable_mosaic.version = 11 : i64} {
  func.func @meta_classifier_kernel(%arg0: i32, %arg1: memref<32x8xf32, #tpu.memory_space<vmem>>, %arg2: memref<8x64xf32, #tpu.memory_space<vmem>>, %arg3: memref<1x64xf32, #tpu.memory_space<vmem>>, %arg4: memref<64x128xf32, #tpu.memory_space<vmem>>, %arg5: memref<1x128xf32, #tpu.memory_space<vmem>>, %arg6: memref<32x128xf32, #tpu.memory_space<vmem>>) attributes {dimension_semantics = [#tpu.dimension_semantics<parallel>], iteration_bounds = array<i64: 2>, scalar_prefetch = 0 : i64, scratch_operands = 0 : i64, tpu.core_type = #tpu.core_type<tc>, window_params = [{transform_indices = @transform_0, window_bounds = array<i64: 32, 8>}, {pipeline_mode = #tpu.pipeline_mode<synchronous>, transform_indices = @transform_1, window_bounds = array<i64: 8, 64>}, {pipeline_mode = #tpu.pipeline_mode<synchronous>, transform_indices = @transform_2, window_bounds = array<i64: 1, 64>}, {pipeline_mode = #tpu.pipeline_mode<synchronous>, transform_indices = @transform_3, window_bounds = array<i64: 64, 128>}, {pipeline_mode = #tpu.pipeline_mode<synchronous>, transform_indices = @transform_4, window_bounds = array<i64: 1, 128>}, {transform_indices = @transform_5, window_bounds = array<i64: 32, 128>}]} {
    %c0 = arith.constant 0 : index
    %c0_0 = arith.constant 0 : index
    %0 = vector.load %arg1[%c0, %c0_0] : memref<32x8xf32, #tpu.memory_space<vmem>>, vector<32x8xf32>
    %c0_1 = arith.constant 0 : index
    %c0_2 = arith.constant 0 : index
    %1 = vector.load %arg2[%c0_1, %c0_2] : memref<8x64xf32, #tpu.memory_space<vmem>>, vector<8x64xf32>
    %cst = arith.constant dense<0.000000e+00> : vector<32x64xf32>
    %2 = tpu.matmul %0, %1, %cst {dimension_numbers = #tpu.dot_dimension_numbers<[1], [0], [0], [1], [0, 0, 1, 1], [], []>} : vector<32x8xf32>, vector<8x64xf32>, vector<32x64xf32> -> vector<32x64xf32>
    %c0_3 = arith.constant 0 : index
    %c0_4 = arith.constant 0 : index
    %3 = vector.load %arg3[%c0_3, %c0_4] : memref<1x64xf32, #tpu.memory_space<vmem>>, vector<1x64xf32>
    %4 = vector.broadcast %3 : vector<1x64xf32> to vector<32x64xf32>
    %5 = arith.addf %2, %4 : vector<32x64xf32>
    %cst_5 = arith.constant 0.000000e+00 : f32
    %6 = vector.broadcast %cst_5 : f32 to vector<32x64xf32>
    %7 = arith.maximumf %5, %6 : vector<32x64xf32>
    %c0_6 = arith.constant 0 : index
    %c0_7 = arith.constant 0 : index
    %8 = vector.load %arg4[%c0_6, %c0_7] : memref<64x128xf32, #tpu.memory_space<vmem>>, vector<64x128xf32>
    %cst_8 = arith.constant dense<0.000000e+00> : vector<32x128xf32>
    %9 = tpu.matmul %7, %8, %cst_8 {dimension_numbers = #tpu.dot_dimension_numbers<[1], [0], [0], [1], [0, 0, 1, 1], [], []>} : vector<32x64xf32>, vector<64x128xf32>, vector<32x128xf32> -> vector<32x128xf32>
    %c0_9 = arith.constant 0 : index
    %c0_10 = arith.constant 0 : index
    %10 = vector.load %arg5[%c0_9, %c0_10] : memref<1x128xf32, #tpu.memory_space<vmem>>, vector<1x128xf32>
    %11 = vector.broadcast %10 : vector<1x128xf32> to vector<32x128xf32>
    %12 = arith.addf %9, %11 : vector<32x128xf32>
    %cst_11 = arith.constant dense<0xFF800000> : vector<32xf32>
    %13 = vector.multi_reduction <maximumf>, %12, %cst_11 [1] : vector<32x128xf32> to vector<32xf32>
    %14 = vector.shape_cast %13 : vector<32xf32> to vector<32x1xf32>
    %15 = vector.broadcast %14 : vector<32x1xf32> to vector<32x128xf32>
    %16 = arith.subf %12, %15 : vector<32x128xf32>
    %17 = math.exp %16 : vector<32x128xf32>
    %cst_12 = arith.constant dense<0.000000e+00> : vector<32xf32>
    %18 = vector.multi_reduction <add>, %17, %cst_12 [1] : vector<32x128xf32> to vector<32xf32>
    %19 = vector.shape_cast %18 : vector<32xf32> to vector<32x1xf32>
    %20 = tpu.reciprocal %19 : vector<32x1xf32> -> vector<32x1xf32>
    %21 = vector.broadcast %20 : vector<32x1xf32> to vector<32x128xf32>
    %22 = arith.mulf %17, %21 : vector<32x128xf32>
    %c0_13 = arith.constant 0 : index
    %c0_14 = arith.constant 0 : index
    %23 = vector.load %arg6[%c0_13, %c0_14] : memref<32x128xf32, #tpu.memory_space<vmem>>, vector<32x128xf32>
    tpu.vector_store %arg6[%c0_13, %c0_14], %22 {strides = array<i32>} : memref<32x128xf32, #tpu.memory_space<vmem>>, vector<32x128xf32>,
    return
  }
  func.func @transform_0(%arg0: i32) -> (i32, i32) {
    %c0_i32 = arith.constant 0 : i32
    %c0_i32_0 = arith.constant 0 : i32
    return %arg0, %c0_i32 : i32, i32
  }
  func.func @transform_1(%arg0: i32) -> (i32, i32) {
    %c0_i32 = arith.constant 0 : i32
    %c0_i32_0 = arith.constant 0 : i32
    %c0_i32_1 = arith.constant 0 : i32
    return %c0_i32, %c0_i32_0 : i32, i32
  }
  func.func @transform_2(%arg0: i32) -> (i32, i32) {
    %c0_i32 = arith.constant 0 : i32
    %c0_i32_0 = arith.constant 0 : i32
    %c0_i32_1 = arith.constant 0 : i32
    return %c0_i32, %c0_i32_0 : i32, i32
  }
  func.func @transform_3(%arg0: i32) -> (i32, i32) {
    %c0_i32 = arith.constant 0 : i32
    %c0_i32_0 = arith.constant 0 : i32
    %c0_i32_1 = arith.constant 0 : i32
    return %c0_i32, %c0_i32_0 : i32, i32
  }
  func.func @transform_4(%arg0: i32) -> (i32, i32) {
    %c0_i32 = arith.constant 0 : i32
    %c0_i32_0 = arith.constant 0 : i32
    %c0_i32_1 = arith.constant 0 : i32
    return %c0_i32, %c0_i32_0 : i32, i32
  }
  func.func @transform_5(%arg0: i32) -> (i32, i32) {
    %c0_i32 = arith.constant 0 : i32
    %c0_i32_0 = arith.constant 0 : i32
    return %arg0, %c0_i32 : i32, i32
  }
}

</mosaic_0001>

<bundles_post_ra>
// kernel: sentiment_meta_classifier.1
= control target key start
LH: loop header
LB: loop body
LE: loop exit
PB: predicated region body
PF: predicated region fallthrough
CT: control target
= control target key end

     0   :  { %s1070_s18 = smov 0   ;;  %s1072_s19 = smov 0   ;;  %s1207_s0 = inlined_call_operand.vmem [shape: f32[50,8], index: 0, kind: input, shape index: {}]   ;;  %s1208_s1 = inlined_call_operand.vmem [shape: f32[8,64], index: 1, kind: input, shape index: {}]   ;;  %s1209_s2 = inlined_call_operand.vmem [shape: f32[1,64], index: 2, kind: input, shape index: {}]   ;;  %s1210_s3 = inlined_call_operand.vmem [shape: f32[64,128], index: 3, kind: input, shape index: {}]   ;;  %s1211_s4 = inlined_call_operand.vmem [shape: f32[1,128], index: 4, kind: input, shape index: {}]   ;;  %s1212_s5 = inlined_call_operand.vmem [shape: f32[50,128], index: 5, kind: output, shape index: {}]  }
   0x1   :  { %s1074_s20 = smov 0  }
   0x2 LB: > { %s1083_s21 = sadd.s32 4294967295, %s1006_s20   ;;  %s1085_s22 = sadd.s32 1, %s1006_s20   ;;  %s1006_s20 = sphi %s1074_s20, %s1219_s20   ;;  %s1002_s19 = sphi %s1072_s19, %s1218_s19   ;;  %s998_s18 = sphi %s1070_s18, %s1217_s18  }
   0x3   : > { %s129_s23 = ssub.s32 %s1006_s20, %s1085_s22  ;;  %s132_s24 = sadd.s32 1, %s1002_s19 }
   0x4   : > { %p130_p0 = scmp.eq.s32.totalorder %s129_s23, 0  ;;  %p142_p1 = scmp.ne.s32.totalorder %s1002_s19, %s998_s18 }
   0x5   : > { %p143_p2 = scmp.eq.s32.totalorder %s1083_s21, 1  ;;  %p743_p3 = scmp.ge.s32.totalorder %s1006_s20, 1 }
   0x6   : > { %s1093_s25 = scalar_select %p130_p0, %s1002_s19, %s132_s24  }
   0x7   : > { %p1095_p4 = por %p143_p2, %p142_p1  ;;  %p196_p5 = scmp.lt.s32.totalorder %s1006_s20, 3 }
   0x9   : > { %p197_p6 = pnand %p743_p3, %p196_p5 }
   0xa   : > { %v250_v0 = vld [vmem:[%s1208_s1] sm:$0xff] (!%p197_p6)  ;;  %s1103_s29 = sshll.u32 (!%p197_p6), %s1083_s21, 2  ;;  %v361_v2 = vld [vmem:[%s1210_s3 + $0x8] sm:$0xff] (!%p197_p6)  ;;  %v362_v4 = vld [vmem:[%s1210_s3 + $0x10] sm:$0xff] (!%p197_p6)  ;;  %vm258_vm0 = vcmask (!%p197_p6), 64512   ;;  %vm375_vm1 = vcmask (!%p197_p6), 523264  }
   0xb   : > { %200 = sbr.rel (%p197_p6) target bundleno = 828 (0x33c), region = 40  ;;  %v360_v1 = vld [vmem:[%s1210_s3] sm:$0xff] (!%p197_p6)  ;;  %794 = vmatprep.subr.mxu0 (!%p197_p6), %v250_v0  ;;  %p232_p7 = scmp.lt.s32.totalorder (!%p197_p6), %s1103_s29, 6  ;;  %v363_v5 = vld [vmem:[%s1210_s3 + $0x18] sm:$0xff] (!%p197_p6)  ;;  %v365_v8 = vld [vmem:[%s1210_s3 + $0x28] sm:$0xff] (!%p197_p6) }
   0xc   : > { %v824_v3 = vpack.c.bf16 (!%p197_p6), %v361_v2, %v360_v1  ;;  %795 = vmatpush3.msra.mxu0 (!%p197_p6), %v250_v0  ;;  %v828_v6 = vpack.c.bf16 (!%p197_p6), %v363_v5, %v362_v4  ;;  %v364_v7 = vld [vmem:[%s1210_s3 + $0x20] sm:$0xff] (!%p197_p6)  ;;  %v366_v14 = vld [vmem:[%s1210_s3 + $0x30] sm:$0xff] (!%p197_p6)  ;;  %v367_v15 = vld [vmem:[%s1210_s3 + $0x38] sm:$0xff] (!%p197_p6)  ;;  %s224_s12 = sand.u32 (!%p197_p6), 1, %s998_s18  }
   0xd   : > { %v832_v12 = vpack.c.bf16 (!%p197_p6), %v365_v8, %v364_v7  ;;  %v836_v16 = vpack.c.bf16 (!%p197_p6), %v367_v15, %v366_v14  ;;  %v747_v17 = vld [vmem:[%s1209_s2] ss:$0 sm:$0xff] (!%p197_p6) }
   0xe   : > { %825 = vmatprep.subr.bf16.mxu0 (!%p197_p6), %v824_v3  ;;  %840 = vmatprep.subr.bf16.mxu1 (!%p197_p6), %v824_v3  ;;  %v752_v30 = vld [vmem:[%s1211_s4] ss:$0 sm:$0xff] (!%p197_p6) }
   0xf   : > { %844 = vmatpush3.bf16.msra.mxu1 (!%p197_p6), %v824_v3 }
  0x10   : > { %841 = vmatprep.subr.bf16.mxu1 (!%p197_p6), %v828_v6 }
  0x12   : > { %s233_s13 = scalar_select %p232_p7, %s1103_s29, 6 }
  0x13   : > { %845 = vmatpush3.bf16.msra.mxu1 %v828_v6  ;;  %s521_s18 = ssub.s32 (%p1095_p4), 7, %s1103_s29  ;;  %s774_s15 = sshll.u32 (%p1095_p4), %s1083_s21, 5 }
  0x14   : > { %s746_s20 = sshll.u32 %s233_s13, 3  ;;  %842 = vmatprep.subr.bf16.mxu1 %v832_v12  ;;  %s744_s13 = sshll.u32 %s224_s12, 5 }
  0x15   : > { %s235_s27 = scalar_lea.vmem %s1207_s0, %s746_s20  ;;  %s1145_s14 = scalar_lea.vmem [#allocation2], %s744_s13  }
  0x16   : > { %v246_v9 = vld [vmem:[%s235_s27] sm:$0xff]  ;;  %v247_v10 = vld [vmem:[%s235_s27 + $0x8] sm:$0xff]  ;;  %v248_v11 = vld [vmem:[%s235_s27 + $0x10] sm:$0xff]  ;;  %p522_p8 = scmp.lt.s32.totalorder (%p1095_p4), %s521_s18, 4  ;;  %s1158_s20 = scalar_lea.vmem (%p1095_p4), %s1212_s5, %s774_s15  }
  0x17   : > { %796 = vmatprep.mubr.msk.f32.mxu0 %vm258_vm0, %v246_v9  ;;  %v249_v13 = vld [vmem:[%s235_s27 + $0x18] sm:$0xff]  ;;  %846 = vmatpush3.bf16.msra.mxu1 %v832_v12 }
  0x18   : > { %797 = vmatmul.mubr.msk.f32.vlgmr.msra.gmra.mrb[0].mxu0 %vm258_vm0, %v247_v10  ;;  %843 = vmatprep.subr.bf16.mxu1 %v836_v16 }
  0x19   : > { %799 = vmatprep.mubr.msk.f32.mxu0 %vm258_vm0, %v248_v11  ;;  %827 = vmatpush3.bf16.msra.mxu0 %v824_v3 }
  0x1a   : > { %829 = vmatprep.subr.bf16.mxu0 %v828_v6 }
  0x1b   : > { %847 = vmatpush3.bf16.msra.mxu1 %v836_v16 }
  0x1c   : > { %800 = vmatmul.mubr.msk.f32.gmra.mrb[2].mxu0 %vm258_vm0, %v249_v13 }
  0x1d   : > { %831 = vmatpush3.bf16.msra.mxu0 %v828_v6 }
  0x1e   : > { %833 = vmatprep.subr.bf16.mxu0 %v832_v12 }
  0x21   : > { %835 = vmatpush3.bf16.msra.mxu0 %v832_v12 }
  0x22   : > { %837 = vmatprep.subr.bf16.mxu0 %v836_v16 }
  0x25   : > { %839 = vmatpush3.bf16.msra.mxu0 %v836_v16 }
  0xeb   : > { %v798_v18 = vpop.f32.mrb[0].mxu0 }
  0xec   : > { %v343_v19 = vadd.f32 %v798_v18, %v747_v17  ;;  %v337_v20 = vpop.f32.mrb[1].mxu0 }
  0xed   : > { %v338_v21 = vadd.f32 %v747_v17, %v337_v20 }
  0xee   : > { %v357_v24 = vmax.f32 %v343_v19, 0.0 }
  0xef   : > { %v356_v22 = vmax.f32 %v338_v21, 0.0  ;;  %v801_v23 = vpop.f32.mrb[2].mxu0 }
  0xf0   : > { %v353_v25 = vadd.f32 %v801_v23, %v747_v17  ;;  %v347_v26 = vpop.f32.mrb[3].mxu0 }
  0xf1   : > { %v348_v27 = vadd.f32 %v747_v17, %v347_v26  ;;  %818 = vmatprep.mubr.msk.f32.mxu0 %vm375_vm1, %v356_v22 }
  0xf2   : > { %819 = vmatmul.mubr.msk.f32.vlgmr.msra.gmra.mrb[4].mxu0 %vm375_vm1, %v357_v24  ;;  %v359_v29 = vmax.f32 %v353_v25, 0.0 }
  0xf3   : > { %v358_v28 = vmax.f32 %v348_v27, 0.0 }
  0xf5   : > { %821 = vmatprep.mubr.msk.f32.mxu1 %vm375_vm1, %v358_v28 }
  0xf6   : > { %822 = vmatmul.mubr.msk.f32.vlgmr.msra.gmra.mrb[0].mxu1 %vm375_vm1, %v359_v29 }
 0x1c5   : > { %v820_v31 = vpop.f32.mrb[4].mxu0 }
 0x1c6   : > { %v454_v32 = vpop.f32.mrb[5].mxu0  ;;  %v460_v36 = vadd.f32 %v820_v31, %v752_v30 }
 0x1c7   : > { %v455_v33 = vadd.f32 %v752_v30, %v454_v32 }
 0x1c9   : > { %v823_v34 = vpop.f32.mrb[0].mxu1  ;;  %473 = vmax.xlane.f32.xlu0 %v455_v33 }
 0x1ca   : > { %v464_v35 = vpop.f32.mrb[1].mxu1  ;;  %v470_v38 = vadd.f32 %v823_v34, %v752_v30 }
 0x1cb   : > { %v465_v37 = vadd.f32 %v752_v30, %v464_v35 }
 0x1cd   : > { %477 = vmax.xlane.f32.xlu1 %v465_v37  ;;  %475 = vmax.xlane.f32.xlu0 %v460_v36 }
 0x1d1   : > { %479 = vmax.xlane.f32.xlu1 %v470_v38 }
 0x256   : > { %v474_v39 = vpop.xlane.xlu0 %473 }
 0x257   : > { %v481_v40 = vsub.f32 %v455_v33, %v474_v39 }
 0x259   : > { %v485_v41 = vmul.f32 1.442695, %v481_v40 }
 0x25a   : > { %v478_v42 = vpop.xlane.xlu1 %477  ;;  %v476_v43 = vpop.xlane.xlu0 %475 }
 0x25b   : > { %936 = vpow2.f32 %v485_v41  ;;  %v483_v44 = vsub.f32 %v465_v37, %v478_v42  ;;  %v482_v45 = vsub.f32 %v460_v36, %v476_v43 }
 0x25d   : > { %v489_v46 = vmul.f32 1.442695, %v483_v44  ;;  %v487_v47 = vmul.f32 1.442695, %v482_v45 }
 0x25e   : > { %v480_v48 = vpop.xlane.xlu1 %479 }
 0x25f   : > { %938 = vpow2.f32 %v489_v46  ;;  %v484_v49 = vsub.f32 %v470_v38, %v480_v48 }
 0x260   : > { %940 = vpow2.f32 %v487_v47 }
 0x261   : > { %v491_v50 = vmul.f32 1.442695, %v484_v49 }
 0x263   : > { %942 = vpow2.f32 %v491_v50 }
 0x265   : > { %v937_v51 = vpop.eup %936 }
 0x266   : > { %493 = vadd.xlane.f32.xlu0 %v937_v51 }
 0x269   : > { %v939_v52 = vpop.eup %938 }
 0x26a   : > { %v941_v53 = vpop.eup %940  ;;  %497 = vadd.xlane.f32.xlu0 %v939_v52 }
 0x26b   : > { %495 = vadd.xlane.f32.xlu1 %v941_v53 }
 0x26d   : > { %v943_v54 = vpop.eup %942 }
 0x26f   : > { %499 = vadd.xlane.f32.xlu1 %v943_v54 }
 0x2f3   : > { %v494_v55 = vpop.xlane.xlu0 %493 }
 0x2f4   : > { %944 = vrcp.f32 %v494_v55 }
 0x2f7   : > { %v498_v56 = vpop.xlane.xlu0 %497 }
 0x2f8   : > { %v496_v57 = vpop.xlane.xlu1 %495  ;;  %946 = vrcp.f32 %v498_v56 }
 0x2f9   : > { %948 = vrcp.f32 %v496_v57 }
 0x2fc   : > { %v500_v58 = vpop.xlane.xlu1 %499 }
 0x2fd   : > { %950 = vrcp.f32 %v500_v58 }
 0x2fe   : > { %v945_v59 = vpop.eup %944 }
 0x2ff   : > { %v505_v60 = vmul.f32 %v945_v59, %v937_v51 }
 0x301   : > { %509 = vst [vmem:[%s1145_s14] sm:$0xff] %v505_v60 }
 0x302   : > { %v947_v61 = vpop.eup %946 }
 0x303   : > { %v949_v62 = vpop.eup %948  ;;  %v507_v63 = vmul.f32 %v947_v61, %v939_v52 }
 0x304   : > { %v506_v0 = vmul.f32 %v949_v62, %v941_v53  ;;  %519 = sbr.rel (!%p1095_p4) target bundleno = 828 (0x33c), region = 44 }
 0x305   : > { %511 = vst [vmem:[%s1145_s14 + $0x10] sm:$0xff] %v507_v63 }
 0x306   : > { %510 = vst [vmem:[%s1145_s14 + $0x8] sm:$0xff] %v506_v0 }
 0x307   : > { %v951_v1 = vpop.eup %950 }
 0x308   : > { %v508_v2 = vmul.f32 %v951_v1, %v943_v54 }
 0x30a   : > { %512 = vst [vmem:[%s1145_s14 + $0x18] sm:$0xff] %v508_v2 }
 0x30b   : > { %s1221_s18 = smov (!%p522_p8, %s521_s18), 4 }
 0x30c   : > { %s759_s23 = sshll.u32 %s1221_s18, 7 }
 0x30d   : > { %p762_p9 = scmp.eq.s32.totalorder %s759_s23, 0 }
 0x30e   : > { %s1164_s24 = sshrl.u32 (!%p762_p9), %s1221_s18, 2 }
 0x30f   : > { %530 = sbr.rel (%p762_p9) target bundleno = 828 (0x33c), region = 48  ;;  %p763_p10 = scmp.le.s32.totalorder (!%p762_p9), %s1164_s24, 0 }
 0x316   : > { %696 = sbr.rel (%p763_p10) target bundleno = 807 (0x327), region = 124  ;;  %s1214_s21 = smov (!%p763_p10), %s1158_s20 }
 0x317   : > { %s1215_s26 = smov (!%p763_p10), %s1145_s14  ;;  %s1173_s29 = smov (!%p763_p10), 0  }
 0x318   : > { %s1020_s27 = smov (!%p763_p10), 0  }
 0x31d LB: >> { %v598_v3 = vld [vmem:[%s1014_s26] sm:$0xff]  ;;  %v600_v4 = vld [vmem:[%s1014_s26 + $0x8] sm:$0xff]  ;;  %v602_v5 = vld [vmem:[%s1014_s26 + $0x10] sm:$0xff]  ;;  %s606_s28 = sadd.s32 1, %s1018_s29  ;;  %s592_s27 = sadd.s32 1, %s1022_s27   ;;  %s1022_s27 = sphi %s1020_s27, %s592_s27   ;;  %s1018_s29 = sphi %s1173_s29, %s1216_s29   ;;  %s1014_s26 = sphi %s1215_s26, %s611_s26   ;;  %s1010_s21 = sphi %s1214_s21, %s612_s21  }
 0x31e   : >> { %599 = vst [vmem:[%s1010_s21] sm:$0xff] %v598_v3  ;;  %601 = vst [vmem:[%s1010_s21 + $0x8] sm:$0xff] %v600_v4  ;;  %v604_v6 = vld [vmem:[%s1014_s26 + $0x18] sm:$0xff]  ;;  %p607_p11 = scmp.ge.s32.totalorder %s606_s28, %s1164_s24  ;;  %p591_p12 = scmp.ge.s32.totalorder %s592_s27, %s1164_s24 }
 0x31f   : >> { %603 = vst [vmem:[%s1010_s21 + $0x10] sm:$0xff] %v602_v5  ;;  %605 = vst [vmem:[%s1010_s21 + $0x18] sm:$0xff] %v604_v6 }
 0x320   : >> { %s1223_s28 = smov (%p607_p11, %s606_s28), 0  ;;  %594 = sbr.rel (!%p591_p12) target bundleno = 797 (0x31d), region = 130 }
 0x321   : >> { %s764_s30 = sshll.u32 %s1223_s28, 5  ;;  %s1216_s29 = smov %s1223_s28 }
 0x322   : >> { %s611_s26 = scalar_lea.vmem %s1145_s14, %s764_s30 [#allocation2]   ;;  %s612_s21 = scalar_lea.vmem %s1158_s20, %s764_s30  }
 0x327 PF: > { %s1189_s6 = sand.u32 3, %s1221_s18   ;;  %s775_s7 = sshll.u32 %s1164_s24, 5 }
 0x328   : > { %s617_s8 = scalar_lea.vmem %s1145_s14, %s775_s7 [#allocation2]   ;;  %s619_s9 = scalar_lea.vmem %s1158_s20, %s775_s7  }
 0x329   : > { %p769_p13 = scmp.le.s32.totalorder %s1189_s6, 0 }
 0x32a   : > { %s1024_s10 = smov (!%p769_p13), %s619_s9   ;;  %s1028_s11 = smov (!%p769_p13), %s617_s8  }
 0x32b   : > { %710 = sbr.rel (%p769_p13) target bundleno = 828 (0x33c), region = 135  ;;  %s1032_s12 = smov (!%p769_p13), 0  }
 0x32c   : > { %s1036_s13 = smov (!%p769_p13), 0  }
 0x332 LB: >> { %v629_v7 = vld [vmem:[%s1030_s11] sm:$0xff]  ;;  %s631_s18 = sadd.s32 1, %s1034_s12  ;;  %s623_s13 = sadd.s32 1, %s1038_s13   ;;  %s1038_s13 = sphi %s1036_s13, %s623_s13   ;;  %s1034_s12 = sphi %s1032_s12, %s1033_s12   ;;  %s1030_s11 = sphi %s1028_s11, %s636_s11   ;;  %s1026_s10 = sphi %s1024_s10, %s637_s10  }
 0x333   : >> { %630 = vst [vmem:[%s1026_s10] sm:$0xff] %v629_v7  ;;  %p632_p0 = scmp.ge.s32.totalorder %s631_s18, %s1189_s6  ;;  %p622_p1 = scmp.ge.s32.totalorder %s623_s13, %s1189_s6 }
 0x335   : >> { %s1225_s18 = smov (%p632_p0, %s631_s18), 0  ;;  %625 = sbr.rel (!%p622_p1) target bundleno = 818 (0x332), region = 141 }
 0x336   : >> { %s770_s14 = sshll.u32 %s1225_s18, 3  ;;  %s1033_s12 = smov %s1225_s18  }
 0x337   : >> { %s636_s11 = scalar_lea.vmem %s617_s8, %s770_s14 [#allocation2]   ;;  %s637_s10 = scalar_lea.vmem %s619_s9, %s770_s14  }
 0x33c PF: > { %p12_p2 = scmp.ge.s32.totalorder %s1085_s22, 4   ;;  %s1217_s18 = smov %s1002_s19 }
 0x33d   : > { %s1218_s19 = smov %s1093_s25  ;;  %s1219_s20 = smov %s1085_s22 }
 0x33e   :  { %14 = sbr.rel (!%p12_p2) target bundleno = 2 (0x2), region = 152 }

</bundles_post_ra>
